<compile_context>
chip_gen: v6e
topology: v6e:2x2x1
jax: 0.10.0
libtpu: 0.0.40
codegen_flags: <defaults>
</compile_context>

<pallas_src>
import functools

import jax
import jax.numpy as jnp
import numpy as np
from jax import lax
from jax.experimental import pallas as pl
from jax.experimental.pallas import tpu as pltpu

_VMEM_CAP = 48 << 20    # vmem_limit_bytes: < v7x's 64 MiB physical; raises v5e/v6e scoped defaults
_VMEM_SLACK = 4 << 20   # headroom for Mosaic-internal scratch
_MAX_TK = 8192          # lane-tile cap


def _pick_tk(m, k_dim, itemsize, resident_bytes, max_tk):
    """Largest K (lane) tile such that a double-buffered (m, tk) feature tile plus
    the resident Gram-sized buffers fit the VMEM budget.  tk is a multiple of 256
    (128 for small budgets/overrides).  If all of K fits in one tile we use tk == K
    exactly (a block equal to the full dim needs no 128 alignment), so nothing is
    ever padded or streamed twice."""
    feat_budget = _VMEM_CAP - _VMEM_SLACK - resident_bytes
    per_col = 2 * m * itemsize                      # double-buffered feature bytes per K column
    tk = min(feat_budget // per_col, max_tk)
    if tk >= 256:
        tk = tk // 256 * 256                        # match the 256-wide MXU on v6e/v7x
    else:
        tk = tk // 128 * 128
    if tk < 128:
        # TODO(synk): tile the Gram over (i, j) row/col blocks so M >= ~2048 fits VMEM.
        raise NotImplementedError(
            "Resident Gram too large for single-block accumulation at this M.")
    if k_dim <= tk:
        return int(k_dim)                           # single K step, no ragged tail
    return int(tk)


def _accumulate_gram(feat_ref, acc_ref, *, k_true, tk):
    """Accumulate features @ features.T for the current K tile into acc_ref,
    masking the ragged tail of the last tile (no host-side padding)."""
    k = pl.program_id(0)

    @pl.when(k == 0)
    def _():
        acc_ref[...] = jnp.zeros_like(acc_ref)

    def _acc(f):
        # Contract the lane axis of both operands on the MXU (no explicit transpose
        # materialized per step); f32 accumulation via preferred_element_type.
        acc_ref[...] += lax.dot_general(
            f, f,
            dimension_numbers=(((1,), (1,)), ((), ())),
            preferred_element_type=jnp.float32)

    rem = k_true % tk                               # static at trace time
    if rem == 0:
        _acc(feat_ref[...])
    else:
        last = pl.num_programs(0) - 1

        @pl.when(k < last)
        def _():
            _acc(feat_ref[...])

        @pl.when(k == last)
        def _():
            f = feat_ref[...]
            col = lax.broadcasted_iota(jnp.int32, f.shape, 1)
            # select (not multiply) so OOB garbage (possibly NaN) cannot propagate
            _acc(jnp.where(col < rem, f, jnp.zeros([], f.dtype)))


def _gram_kernel(feat_ref, gram_ref, *, inv_norm, k_true, tk):
    # Gram-only path (target feature): accumulate directly into the resident output.
    _accumulate_gram(feat_ref, gram_ref, k_true=k_true, tk=tk)

    @pl.when(pl.program_id(0) == pl.num_programs(0) - 1)
    def _():
        gram_ref[...] *= inv_norm


def _gram_mse_kernel(feat_ref, tgt_ref, loss_ref, acc_ref,
                     *, inv_norm, inv_count, k_true, tk):
    # Forward path: the Gram lives only in VMEM scratch (never written to HBM).
    _accumulate_gram(feat_ref, acc_ref, k_true=k_true, tk=tk)

    @pl.when(pl.program_id(0) == pl.num_programs(0) - 1)
    def _():
        diff = acc_ref[...] * inv_norm - tgt_ref[...]
        loss_ref[0, 0] = jnp.sum(diff * diff) * inv_count


def _compiler_params():
    return pltpu.CompilerParams(
        dimension_semantics=("arbitrary",),         # K is a reduction axis
        vmem_limit_bytes=_VMEM_CAP)


def gram_matrix_pallas(features, *, norm, max_tk=_MAX_TK):
    """Gram matrix of (M, K) features: (features @ features.T) / norm, f32 (M, M)."""
    m, k_dim = features.shape
    itemsize = jnp.dtype(features.dtype).itemsize
    resident = 2 * m * m * 4                        # resident Gram output (double-buffer bound)
    tk = _pick_tk(m, k_dim, itemsize, resident, max_tk)
    cost = pl.CostEstimate(flops=2 * m * m * k_dim, transcendentals=0,
                           bytes_accessed=m * k_dim * itemsize + m * m * 4)
    kernel = functools.partial(_gram_kernel, inv_norm=1.0 / float(norm),
                               k_true=k_dim, tk=tk)
    return pl.pallas_call(
        kernel,
        out_shape=jax.ShapeDtypeStruct((m, m), jnp.float32),
        grid_spec=pltpu.PrefetchScalarGridSpec(
            num_scalar_prefetch=0,
            grid=(pl.cdiv(k_dim, tk),),
            in_specs=[pl.BlockSpec((m, tk), lambda kk: (0, kk))],
            out_specs=pl.BlockSpec((m, m), lambda kk: (0, 0))),
        compiler_params=_compiler_params(),
        cost_estimate=cost,
    )(features)


def style_mse_pallas(features, target_gram, *, norm, count, max_tk=_MAX_TK):
    """mean((gram(features)/norm - target_gram)^2): scalar f32 (returned as 0-d)."""
    m, k_dim = features.shape
    itemsize = jnp.dtype(features.dtype).itemsize
    resident = 2 * m * m * 4 + m * m * 4            # resident target (x2) + acc scratch
    tk = _pick_tk(m, k_dim, itemsize, resident, max_tk)
    cost = pl.CostEstimate(flops=2 * m * m * k_dim + 3 * m * m, transcendentals=0,
                           bytes_accessed=m * k_dim * itemsize + m * m * 4 + 4)
    kernel = functools.partial(_gram_mse_kernel, inv_norm=1.0 / float(norm),
                               inv_count=1.0 / float(count), k_true=k_dim, tk=tk)
    loss = pl.pallas_call(
        kernel,
        out_shape=jax.ShapeDtypeStruct((1, 1), jnp.float32),
        grid_spec=pltpu.PrefetchScalarGridSpec(
            num_scalar_prefetch=0,
            grid=(pl.cdiv(k_dim, tk),),
            in_specs=[pl.BlockSpec((m, tk), lambda kk: (0, kk)),
                      pl.BlockSpec((m, m), lambda kk: (0, 0))],
            out_specs=pl.BlockSpec(memory_space=pltpu.MemorySpace.SMEM),
            scratch_shapes=[pltpu.VMEM((m, m), jnp.float32)]),
        compiler_params=_compiler_params(),
        cost_estimate=cost,
    )(features, target_gram)
    return loss[0, 0]


@functools.partial(jax.jit, static_argnames=("compute_dtype", "max_tk"))
def _target_gram(target_feature, *, compute_dtype=None, max_tk=_MAX_TK):
    a, b, c, d = target_feature.shape
    feats = target_feature.reshape(a * b, c * d)
    if compute_dtype is not None:
        feats = feats.astype(compute_dtype)
    return gram_matrix_pallas(feats, norm=a * b * c * d, max_tk=max_tk)


@functools.partial(jax.jit, static_argnames=("compute_dtype", "max_tk"))
def _style_forward(x, target_gram, *, compute_dtype=None, max_tk=_MAX_TK):
    a, b, c, d = x.shape
    feats = x.reshape(a * b, c * d)
    if compute_dtype is not None:
        feats = feats.astype(compute_dtype)
    return style_mse_pallas(feats, target_gram,
                            norm=a * b * c * d, count=(a * b) * (a * b),
                            max_tk=max_tk)


class StyleLoss:
    """JAX/Pallas port of the PyTorch StyleLoss module (forward pass).

    compute_dtype: optional streaming/contraction dtype (e.g. jnp.bfloat16) for
    f32 inputs — halves HBM traffic and uses the MXU's native bf16 rate, with a
    small numerics change; accumulation stays f32 either way.  Default None keeps
    exact native-dtype streaming.
    """

    def __init__(self, target_feature, compute_dtype=None):
        self._compute_dtype = compute_dtype
        self.target = _target_gram(jnp.asarray(target_feature),
                                   compute_dtype=compute_dtype)
        self.loss = None

    def __call__(self, x):
        x = jnp.asarray(x)
        self.loss = _style_forward(x, self.target,
                                   compute_dtype=self._compute_dtype)
        return x                                    # forward returns its input


def _gram_ref(t):
    a, b, c, d = t.shape
    f = t.reshape(a * b, c * d).astype(jnp.float32)
    return (f @ f.T) / (a * b * c * d)


if __name__ == "__main__":
    key = jax.random.PRNGKey(0)
    k_tgt, k_in, k_tgt2, k_in2 = jax.random.split(key, 4)

    # Small shapes consistent with a conv feature map: NCHW = (2, 4, 16, 16).
    target_feature = jax.random.normal(k_tgt, (2, 4, 16, 16), dtype=jnp.float32)
    x = jax.random.normal(k_in, (2, 4, 16, 16), dtype=jnp.float32)

    module = StyleLoss(target_feature)
    out = module(x)
    out = jax.block_until_ready(out)
    loss = jax.block_until_ready(module.loss)

    # Reference check against plain-JAX semantics of the PyTorch module.
    G_ref = _gram_ref(x)
    T_ref = _gram_ref(target_feature)
    loss_ref = jnp.mean((G_ref - T_ref) ** 2)

    assert out.shape == x.shape and np.allclose(np.asarray(out), np.asarray(x))
    assert np.allclose(np.asarray(module.target), np.asarray(T_ref),
                       rtol=1e-5, atol=1e-5)
    assert np.allclose(float(loss), float(loss_ref), rtol=1e-5, atol=1e-6)

    # Exercise the multi-step reduction + ragged-K-tail masking path:
    # K = 10*30 = 300 with a forced tk = 128 -> 3 K tiles, last tile masked
    # in-kernel (no host-side padding anywhere).
    tf2 = jax.random.normal(k_tgt2, (2, 4, 10, 30), dtype=jnp.float32)
    x2 = jax.random.normal(k_in2, (2, 4, 10, 30), dtype=jnp.float32)
    tgt2 = jax.block_until_ready(_target_gram(tf2, max_tk=128))
    loss2 = jax.block_until_ready(_style_forward(x2, tgt2, max_tk=128))
    T2_ref = _gram_ref(tf2)
    loss2_ref = jnp.mean((_gram_ref(x2) - T2_ref) ** 2)
    assert np.allclose(np.asarray(tgt2), np.asarray(T2_ref), rtol=1e-5, atol=1e-5)
    assert np.allclose(float(loss2), float(loss2_ref), rtol=1e-5, atol=1e-6)

    print("KERNEL_OK")
</pallas_src>

<mosaic_0001>
module attributes {stable_mosaic.version = 11 : i64} {
  func.func @_gram_kernel(%arg0: i32, %arg1: memref<8x256xf32, #tpu.memory_space<vmem>>, %arg2: memref<8x8xf32, #tpu.memory_space<vmem>>) attributes {dimension_semantics = [#tpu.dimension_semantics<arbitrary>], iteration_bounds = array<i64: 1>, scalar_prefetch = 0 : i64, scratch_operands = 0 : i64, tpu.core_type = #tpu.core_type<tc>, window_params = [{transform_indices = @transform_0, window_bounds = array<i64: 8, 256>}, {pipeline_mode = #tpu.pipeline_mode<synchronous>, transform_indices = @transform_1, window_bounds = array<i64: 8, 8>}]} {
    %c0_i32 = arith.constant 0 : i32
    %0 = arith.cmpi eq, %arg0, %c0_i32 : i32
    %1 = arith.extui %0 : i1 to i32
    %c0_i32_0 = arith.constant 0 : i32
    %2 = arith.cmpi ne, %1, %c0_i32_0 : i32
    scf.if %2 {
      %cst_8 = arith.constant 0.000000e+00 : f32
      %11 = vector.broadcast %cst_8 : f32 to vector<8x8xf32>
      %c0_9 = arith.constant 0 : index
      %c0_10 = arith.constant 0 : index
      %12 = vector.load %arg2[%c0_9, %c0_10] : memref<8x8xf32, #tpu.memory_space<vmem>>, vector<8x8xf32>
      tpu.vector_store %arg2[%c0_9, %c0_10], %11 {strides = array<i32>} : memref<8x8xf32, #tpu.memory_space<vmem>>, vector<8x8xf32>,
    } else {
    }
    %c0 = arith.constant 0 : index
    %c0_1 = arith.constant 0 : index
    %3 = vector.load %arg1[%c0, %c0_1] : memref<8x256xf32, #tpu.memory_space<vmem>>, vector<8x256xf32>
    %c0_2 = arith.constant 0 : index
    %c0_3 = arith.constant 0 : index
    %4 = vector.load %arg2[%c0_2, %c0_3] : memref<8x8xf32, #tpu.memory_space<vmem>>, vector<8x8xf32>
    %cst = arith.constant dense<0.000000e+00> : vector<8x8xf32>
    %5 = tpu.matmul %3, %3, %cst {dimension_numbers = #tpu.dot_dimension_numbers<[1], [1], [0], [0], [0, 0, 1, 0], [], []>} : vector<8x256xf32>, vector<8x256xf32>, vector<8x8xf32> -> vector<8x8xf32>
    %6 = arith.addf %4, %5 : vector<8x8xf32>
    %c0_4 = arith.constant 0 : index
    %c0_5 = arith.constant 0 : index
    %7 = vector.load %arg2[%c0_4, %c0_5] : memref<8x8xf32, #tpu.memory_space<vmem>>, vector<8x8xf32>
    tpu.vector_store %arg2[%c0_4, %c0_5], %6 {strides = array<i32>} : memref<8x8xf32, #tpu.memory_space<vmem>>, vector<8x8xf32>,
    %c0_i32_6 = arith.constant 0 : i32
    %8 = arith.cmpi eq, %arg0, %c0_i32_6 : i32
    %9 = arith.extui %8 : i1 to i32
    %c0_i32_7 = arith.constant 0 : i32
    %10 = arith.cmpi ne, %9, %c0_i32_7 : i32
    scf.if %10 {
      %c0_8 = arith.constant 0 : index
      %c0_9 = arith.constant 0 : index
      %11 = vector.load %arg2[%c0_8, %c0_9] : memref<8x8xf32, #tpu.memory_space<vmem>>, vector<8x8xf32>
      %cst_10 = arith.constant 4.8828125E-4 : f32
      %12 = vector.broadcast %cst_10 : f32 to vector<8x8xf32>
      %13 = arith.mulf %11, %12 : vector<8x8xf32>
      %c0_11 = arith.constant 0 : index
      %c0_12 = arith.constant 0 : index
      %14 = vector.load %arg2[%c0_11, %c0_12] : memref<8x8xf32, #tpu.memory_space<vmem>>, vector<8x8xf32>
      tpu.vector_store %arg2[%c0_11, %c0_12], %13 {strides = array<i32>} : memref<8x8xf32, #tpu.memory_space<vmem>>, vector<8x8xf32>,
    } else {
    }
    return
  }
  func.func @transform_0(%arg0: i32) -> (i32, i32) {
    %c0_i32 = arith.constant 0 : i32
    %c0_i32_0 = arith.constant 0 : i32
    return %c0_i32, %arg0 : i32, i32
  }
  func.func @transform_1(%arg0: i32) -> (i32, i32) {
    %c0_i32 = arith.constant 0 : i32
    %c0_i32_0 = arith.constant 0 : i32
    %c0_i32_1 = arith.constant 0 : i32
    return %c0_i32, %c0_i32_0 : i32, i32
  }
}

</mosaic_0001>

<bundles_post_ra>
// kernel: _target_gram.1
= control target key start
LH: loop header
LB: loop body
LE: loop exit
PB: predicated region body
PF: predicated region fallthrough
CT: control target
= control target key end

     0   :  { %vm13_vm0 = vcmask 64512   ;;  %s159_s0 = inlined_call_operand.vmem [shape: f32[8,256], index: 0, kind: input, shape index: {}]   ;;  %s160_s1 = inlined_call_operand.hbm [shape: f32[8,8], index: 1, kind: output, shape index: {}]  }
   0x1   :  { %v16_v0 = vld [vmem:[%s159_s0 + $0x8] sm:$0xff]  ;;  %v15_v1 = vld [vmem:[%s159_s0] sm:$0xff] }
   0x2   :  { %6 = vsyncpa [#allocation3], 0  ;;  %48 = vmatprep.subr.mxu0 %v16_v0  ;;  %82 = vmatprep.mubr.f32.mxu0 %v16_v0  ;;  %v135_v2 = vmov 0.0   ;;  %s136_s10 = smov [#allocation2]  }
   0x3   :  { %14 = vst.msk [vmem:[#allocation2] sm:$0xff] %vm13_vm0, %v135_v2  ;;  %49 = vmatpush1.xpose.msra.mxu0 %v15_v1  ;;  %s103_s11 = sshll.u32 %s136_s10, 4  ;;  %s104_s11 = int_to_ptr.vmem [resolvable:$true] %s103_s11 }
   0x4   :  { %s113_s0 = scalar_lea.vmem %s104_s11, 128  ;;  %p118_p1 = scmp.lt.s32.totalorder %s104_s11, %s104_s11 }
   0x5   :  { %p114_p0 = scmp.ne.s32.totalorder %s104_s11, %s113_s0  ;;  %p119_p2 = scmp.lt.s32.totalorder %s113_s0, %s113_s0 }
   0x6   :  { %83 = vmatmul.mubr.f32.vlgmr.msra.gmra.mxu0 %v15_v1 }
   0x7   :  { %p120_p3 = por %p119_p2, %p118_p1 }
   0x9   :  { %p121_p4 = pnand %p120_p3, %p114_p0 }
   0xa   :  { %v17_v3 = vld [vmem:[#allocation2] sm:$0xff] }
  0xc6   :  { %v84_v4 = vpop.f32.mrf.mxu0 }
  0xc7   :  { %v88_v5 = vadd.f32 %v84_v4, %v17_v3 }
  0xc8   :  { %v86_v6 = vpop.f32.mrf.mxu0 }
  0xc9   :  { %90 = vst.msk [vmem:[#allocation2] sm:$0xff] %vm13_vm0, %v88_v5 }
  0xd0   :  { %v94_v7 = vld [vmem:[#allocation2] sm:$0xff] }
  0xd1   :  { %v95_v8 = vmul.f32 0.00048828125, %v94_v7 }
  0xd3   :  { %96 = vst.msk [vmem:[#allocation2] sm:$0xff] %vm13_vm0, %v95_v8 }
  0xd4   :  { %124 = shalt.err (!%p121_p4)
}
  0xd5   :  { %106 = dma.vmem_to_hbm [thread:$0]  %s104_s11, 128, %s160_s1, [#allocation3]  }
  0xd6   :  { %133 = dma.done.wait [#allocation3], 128  }
  0xd7   :  { %134 = vsyncadd [#allocation3], 4294967168 }
  0xd8   :  { %110 = vsyncpa [#allocation3], 1 }

</bundles_post_ra>
